<compile_context>
chip_gen: v6e
topology: v6e:2x2x1
jax: 0.10.0
libtpu: 0.0.40
codegen_flags: <defaults>
</compile_context>

<pallas_src>
import functools

import jax
import jax.numpy as jnp
from jax.experimental import pallas as pl
from jax.experimental.pallas import tpu as pltpu


def temporal_block_kernel(x_ref, w1d_ref, b1d_ref, w2_ref, b2_ref, out_ref,
                          carry_x_ref, carry_h_ref, *, K, dilation, pad):
    """One (sample, lane-tile) grid step.

    x_ref      : (Cin,  T)        compute dtype; current lane tile of sample n
    w1d_ref    : (2*Cout, K*Cin)  fused conv1 weight with the 1x1 downsample appended
                                  (rows [Cout:), nonzero only in the tap-(K-1) columns)
    b1d_ref    : (2*Cout, 1)      f32, [b1; bd]
    w2_ref     : (Cout, K*Cout)   fused conv2 weight
    b2_ref     : (Cout, 1)        f32
    out_ref    : (Cout, T)        activation dtype
    carry_x_ref: (Cin,  T)        compute dtype; previous lane tile of x (causal halo)
    carry_h_ref: (Cout, T)        compute dtype; previous lane tile of hidden h (causal halo)
    """
    t = pl.program_id(1)
    T = x_ref.shape[-1]
    cdt = x_ref.dtype
    Cout = w2_ref.shape[0]

    # Causal left edge of every sample: the halo is all zeros (also isolates samples,
    # so per-core carry state stays correct under megacore sharding of the batch axis).
    @pl.when(t == 0)
    def _():
        carry_x_ref[...] = jnp.zeros_like(carry_x_ref)
        carry_h_ref[...] = jnp.zeros_like(carry_h_ref)

    # Hoisted lane index, reused by every tap mask.
    lane = jax.lax.broadcasted_iota(jnp.int32, (1, T), 1)

    def rot_right(a, s):
        # Circular right-rotate along lanes: XLU roll on lane-aligned tiles (free slot while
        # MXU/VPU are busy), register rotate fallback for small / unaligned tiles.
        s = s % T
        if s == 0:
            return a
        if T % 128 == 0:
            return pltpu.roll(a, shift=s, axis=-1)
        return jnp.concatenate([a[:, T - s:], a[:, :T - s]], axis=-1)

    def tap(cur, prev, s):
        # Tap operand with shift s: lane j holds value at global time t*T + j - s.
        # Lanes j < s spill into the previous lane tile (zeros at the causal edge).
        if s == 0:
            return cur
        return jnp.where(lane >= s, rot_right(cur, s), rot_right(prev, s))

    def stacked(cur, prev):
        # Fused-tap (im2col) operand built in-register, directly in the compute dtype:
        # row-block k <-> tap k (shift pad - k*dilation), so W_fused @ stacked == dilated conv.
        return jnp.concatenate(
            [tap(cur, prev, pad - k * dilation) for k in range(K)], axis=0)

    x = x_ref[...]
    xp = carry_x_ref[...]

    # ---- conv1 + fused 1x1 downsample: ONE MXU push, f32 accumulation, single bias add ----
    hr = jnp.dot(w1d_ref[...], stacked(x, xp),
                 preferred_element_type=jnp.float32) + b1d_ref[...]
    h = hr[:Cout]           # conv1 output (chomp folded into the causal shifts); dropout1 = id
    res = hr[Cout:]         # downsample(x) (unshifted-x tap block of the fused weight)

    hc = h.astype(cdt)

    # ---- conv2: ONE MXU push; the hidden activation never leaves VMEM/registers ----
    o = jnp.dot(w2_ref[...], stacked(hc, carry_h_ref[...]),
                preferred_element_type=jnp.float32) + b2_ref[...]
    # dropout2 = identity at inference; `net` has NO ReLU.

    out_ref[...] = (o + res).astype(out_ref.dtype)

    # Carry this tile for the next lane tile's causal halo (skipped on a sample's last tile).
    @pl.when(t + 1 < pl.num_programs(1))
    def _():
        carry_x_ref[...] = x
        carry_h_ref[...] = hc


def _pick_lane_tile(L, pad, target):
    """Largest multiple-of-128 divisor of L that is <= target (and >= pad); else a single tile."""
    if L <= target or L % 128 != 0:
        return L
    T = (target // 128) * 128
    while T >= 128:
        if L % T == 0 and T >= pad:
            return T
        T -= 128
    return L


def temporal_block_last(x, w1, b1, w2, b2, wd, bd, *, kernel_size, dilation,
                        compute_dtype=None, lane_tile_target=2048):
    """x: (N, Cin, L). w1: (Cout, Cin, K), w2: (Cout, Cout, K), wd: (Cout, Cin), b*: (Cout,).

    compute_dtype defaults to x.dtype (pass bf16 activations upstream for MXU peak).
    lane_tile_target: ~2048-4096 on v5e/v6e (128 MiB VMEM), ~1024-2048 on v7x (64 MiB VMEM).
    """
    N, Cin, L = x.shape
    K = kernel_size
    Cout = w1.shape[0]
    pad = (K - 1) * dilation
    cdt = x.dtype if compute_dtype is None else jnp.dtype(compute_dtype)

    T = _pick_lane_tile(L, pad, lane_tile_target)
    num_t = L // T

    # ---- parameter packing (weights only; no activation copy is materialized) ----
    # Fused-tap conv1 weight with the 1x1 downsample appended: W1d[o, k*Cin + c] = w1[o, c, k],
    # rows [Cout:) hold wd in the tap-(K-1) (unshifted-x) columns and zeros elsewhere.
    w1f = jnp.transpose(w1, (0, 2, 1)).reshape(Cout, K * Cin)
    wd_rows = jnp.zeros((Cout, K * Cin), w1.dtype).at[:, (K - 1) * Cin:].set(wd)
    w1d = jnp.concatenate([w1f, wd_rows], axis=0).astype(cdt)            # (2*Cout, K*Cin)
    b1d = jnp.concatenate([b1, bd]).reshape(2 * Cout, 1).astype(jnp.float32)
    w2f = jnp.transpose(w2, (0, 2, 1)).reshape(Cout, K * Cout).astype(cdt)
    b2c = b2.reshape(Cout, 1).astype(jnp.float32)

    x_c = x.astype(cdt)   # no-op when activations already arrive in the compute dtype

    # TODO(synk): for production channel counts, pad Cin/Cout toward the MXU tile (128/256)
    # and consider pl.Buffered(3) on the x spec for v5e; below the roofline ridge the kernel
    # stays HBM-bound and byte reduction (done above) is the real lever.
    kern = functools.partial(temporal_block_kernel, K=K, dilation=dilation, pad=pad)

    itemsize = jnp.dtype(cdt).itemsize
    flops = 2 * N * L * (2 * Cout * K * Cin + Cout * K * Cout)
    bytes_accessed = (x_c.size * itemsize + (w1d.size + w2f.size) * itemsize
                      + (b1d.size + b2c.size) * 4 + N * Cout * L * x.dtype.itemsize)

    return pl.pallas_call(
        kern,
        out_shape=jax.ShapeDtypeStruct((N, Cout, L), x.dtype),
        grid=(N, num_t),
        in_specs=[
            pl.BlockSpec((None, Cin, T), lambda n, t: (n, 0, t)),        # activations (no copy)
            pl.BlockSpec((2 * Cout, K * Cin), lambda n, t: (0, 0)),      # conv1 + downsample w
            pl.BlockSpec((2 * Cout, 1), lambda n, t: (0, 0)),            # [b1; bd]
            pl.BlockSpec((Cout, K * Cout), lambda n, t: (0, 0)),         # conv2 fused weight
            pl.BlockSpec((Cout, 1), lambda n, t: (0, 0)),                # b2
        ],
        out_specs=pl.BlockSpec((None, Cout, T), lambda n, t: (n, 0, t)), # activation-dtype out
        scratch_shapes=[pltpu.VMEM((Cin, T), cdt),                       # causal halo: x
                        pltpu.VMEM((Cout, T), cdt)],                     # causal halo: hidden
        compiler_params=pltpu.CompilerParams(
            dimension_semantics=("parallel", "arbitrary")),
        cost_estimate=pl.CostEstimate(flops=flops, transcendentals=0,
                                      bytes_accessed=bytes_accessed),
    )(x_c, w1d, b1d, w2f, b2c)


def weight_norm_weight(v, g):
    """PyTorch weight_norm (dim=0): w[o] = g[o] * v[o] / ||v[o]||_2."""
    norm = jnp.sqrt(jnp.sum(v * v, axis=(1, 2), keepdims=True))
    return g[:, None, None] * v / norm


def ref_forward(x, w1, b1, w2, b2, wd, bd, *, dilation, compute_dtype):
    """Pure-JAX reference mirroring the PyTorch module (and the kernel's dtype boundaries)."""
    K = w1.shape[2]
    pad = (K - 1) * dilation
    cast = lambda a: a.astype(compute_dtype).astype(jnp.float32)
    xq, w1q, w2q, wdq = cast(x), cast(w1), cast(w2), cast(wd)

    def causal_conv(xx, w, b):
        xp = jnp.pad(xx, ((0, 0), (0, 0), (pad, 0)))
        Lx = xx.shape[2]
        acc = jnp.zeros((xx.shape[0], w.shape[0], Lx), jnp.float32)
        for k in range(w.shape[2]):
            acc = acc + jnp.einsum('oc,ncl->nol', w[:, :, k],
                                   xp[:, :, k * dilation:k * dilation + Lx])
        return acc + b[None, :, None]

    h = causal_conv(xq, w1q, b1)            # dropout = identity at inference
    h = cast(h)                             # same compute-dtype boundary as the kernel
    o2 = causal_conv(h, w2q, b2)
    res = jnp.einsum('oc,ncl->nol', wdq, xq) + bd[None, :, None]
    return o2 + res


if __name__ == "__main__":
    # Small shapes consistent with the module: batch=2, n_inputs=8, n_outputs=16, seq=16
    N, Cin, Cout, L = 2, 8, 16, 16
    K, stride, dilation = 3, 1, 2           # stride fixed to 1 (standard TCN usage)
    pad = (K - 1) * dilation

    key = jax.random.PRNGKey(0)
    ks = jax.random.split(key, 9)

    # Deterministic synthetic parameters mirroring __init__ (weight_norm'd convs, init=True).
    v1 = 0.001 * jax.random.normal(ks[0], (Cout, Cin, K), jnp.float32)
    v1 = v1.at[:, 0, :].add(1.0 / K)
    g1 = 1.0 + 0.1 * jax.random.normal(ks[1], (Cout,), jnp.float32)
    w1 = weight_norm_weight(v1, g1)                    # (Cout, Cin, K)
    b1 = 1e-6 * jax.random.normal(ks[2], (Cout,), jnp.float32)

    v2 = 0.001 * jax.random.normal(ks[3], (Cout, Cout, K), jnp.float32) + 1.0 / K
    g2 = 1.0 + 0.1 * jax.random.normal(ks[4], (Cout,), jnp.float32)
    w2 = weight_norm_weight(v2, g2)                    # (Cout, Cout, K)
    b2 = 1e-6 * jax.random.normal(ks[5], (Cout,), jnp.float32)

    wd = 0.1 * jax.random.normal(ks[6], (Cout, Cin), jnp.float32)   # 1x1 downsample
    bd = 0.1 * jax.random.normal(ks[7], (Cout,), jnp.float32)

    x = jax.random.normal(ks[8], (N, Cin, L), jnp.float32)

    # ---- f32 path: exact PyTorch (eval) semantics ----
    out_f32 = jax.block_until_ready(
        temporal_block_last(x, w1, b1, w2, b2, wd, bd,
                            kernel_size=K, dilation=dilation))
    ref_f32 = ref_forward(x, w1, b1, w2, b2, wd, bd,
                          dilation=dilation, compute_dtype=jnp.float32)
    assert out_f32.shape == (N, Cout, L)
    assert out_f32.dtype == x.dtype
    assert jnp.allclose(out_f32, ref_f32, atol=1e-4, rtol=1e-4), "f32 mismatch vs reference"

    # ---- bf16 activations / bf16 MXU operands / f32 accumulation / bf16 output ----
    x_bf = x.astype(jnp.bfloat16)
    out_bf = jax.block_until_ready(
        temporal_block_last(x_bf, w1, b1, w2, b2, wd, bd,
                            kernel_size=K, dilation=dilation))
    ref_bf = ref_forward(x, w1, b1, w2, b2, wd, bd,
                         dilation=dilation, compute_dtype=jnp.bfloat16)
    assert out_bf.dtype == jnp.bfloat16
    assert jnp.allclose(out_bf.astype(jnp.float32), ref_bf,
                        atol=2e-2, rtol=2e-2), "bf16 mismatch vs reference"

    print("KERNEL_OK")
</pallas_src>

<mosaic_0001>
module attributes {stable_mosaic.version = 11 : i64} {
  func.func @temporal_block_kernel(%arg0: i32, %arg1: i32, %arg2: memref<1x8x16xf32, #tpu.memory_space<vmem>>, %arg3: memref<32x24xf32, #tpu.memory_space<vmem>>, %arg4: memref<32x1xf32, #tpu.memory_space<vmem>>, %arg5: memref<16x48xf32, #tpu.memory_space<vmem>>, %arg6: memref<16x1xf32, #tpu.memory_space<vmem>>, %arg7: memref<1x16x16xf32, #tpu.memory_space<vmem>>, %arg8: memref<8x16xf32, #tpu.memory_space<vmem>>, %arg9: memref<16x16xf32, #tpu.memory_space<vmem>>) attributes {dimension_semantics = [#tpu.dimension_semantics<parallel>, #tpu.dimension_semantics<arbitrary>], iteration_bounds = array<i64: 2, 1>, scalar_prefetch = 0 : i64, scratch_operands = 2 : i64, tpu.core_type = #tpu.core_type<tc>, window_params = [{transform_indices = @transform_0, window_bounds = array<i64: 1, 8, 16>}, {pipeline_mode = #tpu.pipeline_mode<synchronous>, transform_indices = @transform_1, window_bounds = array<i64: 32, 24>}, {pipeline_mode = #tpu.pipeline_mode<synchronous>, transform_indices = @transform_2, window_bounds = array<i64: 32, 1>}, {pipeline_mode = #tpu.pipeline_mode<synchronous>, transform_indices = @transform_3, window_bounds = array<i64: 16, 48>}, {pipeline_mode = #tpu.pipeline_mode<synchronous>, transform_indices = @transform_4, window_bounds = array<i64: 16, 1>}, {transform_indices = @transform_5, window_bounds = array<i64: 1, 16, 16>}]} {
    %c0_i32 = arith.constant 0 : i32
    %0 = arith.cmpi eq, %arg1, %c0_i32 : i32
    %1 = arith.extui %0 : i1 to i32
    %c0_i32_0 = arith.constant 0 : i32
    %2 = arith.cmpi ne, %1, %c0_i32_0 : i32
    scf.if %2 {
      %cst_23 = arith.constant 0.000000e+00 : f32
      %74 = vector.broadcast %cst_23 : f32 to vector<8x16xf32>
      %c0_24 = arith.constant 0 : index
      %c0_25 = arith.constant 0 : index
      %75 = vector.load %arg8[%c0_24, %c0_25] : memref<8x16xf32, #tpu.memory_space<vmem>>, vector<8x16xf32>
      tpu.vector_store %arg8[%c0_24, %c0_25], %74 {strides = array<i32>} : memref<8x16xf32, #tpu.memory_space<vmem>>, vector<8x16xf32>,
      %cst_26 = arith.constant 0.000000e+00 : f32
      %76 = vector.broadcast %cst_26 : f32 to vector<16x16xf32>
      %c0_27 = arith.constant 0 : index
      %c0_28 = arith.constant 0 : index
      %77 = vector.load %arg9[%c0_27, %c0_28] : memref<16x16xf32, #tpu.memory_space<vmem>>, vector<16x16xf32>
      tpu.vector_store %arg9[%c0_27, %c0_28], %76 {strides = array<i32>} : memref<16x16xf32, #tpu.memory_space<vmem>>, vector<16x16xf32>,
    } else {
    }
    %3 = tpu.iota {dimensions = array<i32: 1>} : vector<1x16xi32>
    %c0 = arith.constant 0 : index
    %c0_1 = arith.constant 0 : index
    %c0_2 = arith.constant 0 : index
    %4 = vector.load %arg2[%c0, %c0_1, %c0_2] : memref<1x8x16xf32, #tpu.memory_space<vmem>>, vector<1x8x16xf32>
    %5 = vector.shape_cast %4 : vector<1x8x16xf32> to vector<8x16xf32>
    %c0_3 = arith.constant 0 : index
    %c0_4 = arith.constant 0 : index
    %6 = vector.load %arg8[%c0_3, %c0_4] : memref<8x16xf32, #tpu.memory_space<vmem>>, vector<8x16xf32>
    %c0_5 = arith.constant 0 : index
    %c0_6 = arith.constant 0 : index
    %7 = vector.load %arg3[%c0_5, %c0_6] : memref<32x24xf32, #tpu.memory_space<vmem>>, vector<32x24xf32>
    %c4_i32 = arith.constant 4 : i32
    %8 = vector.broadcast %c4_i32 : i32 to vector<1x16xi32>
    %9 = arith.cmpi sge, %3, %8 : vector<1x16xi32>
    %10 = vector.extract_strided_slice %5 {offsets = [0, 12], sizes = [8, 4], strides = [1, 1]} : vector<8x16xf32> to vector<8x4xf32>
    %11 = vector.extract_strided_slice %5 {offsets = [0, 0], sizes = [8, 12], strides = [1, 1]} : vector<8x16xf32> to vector<8x12xf32>
    %12 = tpu.concatenate %10, %11 in 1 : vector<8x4xf32>, vector<8x12xf32> -> vector<8x16xf32>
    %13 = vector.extract_strided_slice %6 {offsets = [0, 12], sizes = [8, 4], strides = [1, 1]} : vector<8x16xf32> to vector<8x4xf32>
    %14 = vector.extract_strided_slice %6 {offsets = [0, 0], sizes = [8, 12], strides = [1, 1]} : vector<8x16xf32> to vector<8x12xf32>
    %15 = tpu.concatenate %13, %14 in 1 : vector<8x4xf32>, vector<8x12xf32> -> vector<8x16xf32>
    %16 = vector.shape_cast %9 : vector<1x16xi1> to vector<1x16xi1>
    %17 = vector.broadcast %16 : vector<1x16xi1> to vector<8x16xi1>
    %18 = arith.select %17, %12, %15 : vector<8x16xi1>, vector<8x16xf32>
    %c2_i32 = arith.constant 2 : i32
    %19 = vector.broadcast %c2_i32 : i32 to vector<1x16xi32>
    %20 = arith.cmpi sge, %3, %19 : vector<1x16xi32>
    %21 = vector.extract_strided_slice %5 {offsets = [0, 14], sizes = [8, 2], strides = [1, 1]} : vector<8x16xf32> to vector<8x2xf32>
    %22 = vector.extract_strided_slice %5 {offsets = [0, 0], sizes = [8, 14], strides = [1, 1]} : vector<8x16xf32> to vector<8x14xf32>
    %23 = tpu.concatenate %21, %22 in 1 : vector<8x2xf32>, vector<8x14xf32> -> vector<8x16xf32>
    %24 = vector.extract_strided_slice %6 {offsets = [0, 14], sizes = [8, 2], strides = [1, 1]} : vector<8x16xf32> to vector<8x2xf32>
    %25 = vector.extract_strided_slice %6 {offsets = [0, 0], sizes = [8, 14], strides = [1, 1]} : vector<8x16xf32> to vector<8x14xf32>
    %26 = tpu.concatenate %24, %25 in 1 : vector<8x2xf32>, vector<8x14xf32> -> vector<8x16xf32>
    %27 = vector.shape_cast %20 : vector<1x16xi1> to vector<1x16xi1>
    %28 = vector.broadcast %27 : vector<1x16xi1> to vector<8x16xi1>
    %29 = arith.select %28, %23, %26 : vector<8x16xi1>, vector<8x16xf32>
    %30 = tpu.concatenate %18, %29, %5 in 0 : vector<8x16xf32>, vector<8x16xf32>, vector<8x16xf32> -> vector<24x16xf32>
    %cst = arith.constant dense<0.000000e+00> : vector<32x16xf32>
    %31 = tpu.matmul %7, %30, %cst {dimension_numbers = #tpu.dot_dimension_numbers<[1], [0], [0], [1], [0, 0, 1, 1], [], []>} : vector<32x24xf32>, vector<24x16xf32>, vector<32x16xf32> -> vector<32x16xf32>
    %c0_7 = arith.constant 0 : index
    %c0_8 = arith.constant 0 : index
    %32 = vector.load %arg4[%c0_7, %c0_8] : memref<32x1xf32, #tpu.memory_space<vmem>>, vector<32x1xf32>
    %33 = vector.broadcast %32 : vector<32x1xf32> to vector<32x16xf32>
    %34 = arith.addf %31, %33 : vector<32x16xf32>
    %35 = vector.extract_strided_slice %34 {offsets = [0, 0], sizes = [16, 16], strides = [1, 1]} : vector<32x16xf32> to vector<16x16xf32>
    %36 = vector.extract_strided_slice %34 {offsets = [16, 0], sizes = [16, 16], strides = [1, 1]} : vector<32x16xf32> to vector<16x16xf32>
    %c0_9 = arith.constant 0 : index
    %c0_10 = arith.constant 0 : index
    %37 = vector.load %arg5[%c0_9, %c0_10] : memref<16x48xf32, #tpu.memory_space<vmem>>, vector<16x48xf32>
    %c0_11 = arith.constant 0 : index
    %c0_12 = arith.constant 0 : index
    %38 = vector.load %arg9[%c0_11, %c0_12] : memref<16x16xf32, #tpu.memory_space<vmem>>, vector<16x16xf32>
    %c4_i32_13 = arith.constant 4 : i32
    %39 = vector.broadcast %c4_i32_13 : i32 to vector<1x16xi32>
    %40 = arith.cmpi sge, %3, %39 : vector<1x16xi32>
    %41 = vector.extract_strided_slice %35 {offsets = [0, 12], sizes = [16, 4], strides = [1, 1]} : vector<16x16xf32> to vector<16x4xf32>
    %42 = vector.extract_strided_slice %35 {offsets = [0, 0], sizes = [16, 12], strides = [1, 1]} : vector<16x16xf32> to vector<16x12xf32>
    %43 = tpu.concatenate %41, %42 in 1 : vector<16x4xf32>, vector<16x12xf32> -> vector<16x16xf32>
    %44 = vector.extract_strided_slice %38 {offsets = [0, 12], sizes = [16, 4], strides = [1, 1]} : vector<16x16xf32> to vector<16x4xf32>
    %45 = vector.extract_strided_slice %38 {offsets = [0, 0], sizes = [16, 12], strides = [1, 1]} : vector<16x16xf32> to vector<16x12xf32>
    %46 = tpu.concatenate %44, %45 in 1 : vector<16x4xf32>, vector<16x12xf32> -> vector<16x16xf32>
    %47 = vector.shape_cast %40 : vector<1x16xi1> to vector<1x16xi1>
    %48 = vector.broadcast %47 : vector<1x16xi1> to vector<16x16xi1>
    %49 = arith.select %48, %43, %46 : vector<16x16xi1>, vector<16x16xf32>
    %c2_i32_14 = arith.constant 2 : i32
    %50 = vector.broadcast %c2_i32_14 : i32 to vector<1x16xi32>
    %51 = arith.cmpi sge, %3, %50 : vector<1x16xi32>
    %52 = vector.extract_strided_slice %35 {offsets = [0, 14], sizes = [16, 2], strides = [1, 1]} : vector<16x16xf32> to vector<16x2xf32>
    %53 = vector.extract_strided_slice %35 {offsets = [0, 0], sizes = [16, 14], strides = [1, 1]} : vector<16x16xf32> to vector<16x14xf32>
    %54 = tpu.concatenate %52, %53 in 1 : vector<16x2xf32>, vector<16x14xf32> -> vector<16x16xf32>
    %55 = vector.extract_strided_slice %38 {offsets = [0, 14], sizes = [16, 2], strides = [1, 1]} : vector<16x16xf32> to vector<16x2xf32>
    %56 = vector.extract_strided_slice %38 {offsets = [0, 0], sizes = [16, 14], strides = [1, 1]} : vector<16x16xf32> to vector<16x14xf32>
    %57 = tpu.concatenate %55, %56 in 1 : vector<16x2xf32>, vector<16x14xf32> -> vector<16x16xf32>
    %58 = vector.shape_cast %51 : vector<1x16xi1> to vector<1x16xi1>
    %59 = vector.broadcast %58 : vector<1x16xi1> to vector<16x16xi1>
    %60 = arith.select %59, %54, %57 : vector<16x16xi1>, vector<16x16xf32>
    %61 = tpu.concatenate %49, %60, %35 in 0 : vector<16x16xf32>, vector<16x16xf32>, vector<16x16xf32> -> vector<48x16xf32>
    %cst_15 = arith.constant dense<0.000000e+00> : vector<16x16xf32>
    %62 = tpu.matmul %37, %61, %cst_15 {dimension_numbers = #tpu.dot_dimension_numbers<[1], [0], [0], [1], [0, 0, 1, 1], [], []>} : vector<16x48xf32>, vector<48x16xf32>, vector<16x16xf32> -> vector<16x16xf32>
    %c0_16 = arith.constant 0 : index
    %c0_17 = arith.constant 0 : index
    %63 = vector.load %arg6[%c0_16, %c0_17] : memref<16x1xf32, #tpu.memory_space<vmem>>, vector<16x1xf32>
    %64 = vector.broadcast %63 : vector<16x1xf32> to vector<16x16xf32>
    %65 = arith.addf %62, %64 : vector<16x16xf32>
    %66 = arith.addf %65, %36 : vector<16x16xf32>
    %c0_18 = arith.constant 0 : index
    %c0_19 = arith.constant 0 : index
    %c0_20 = arith.constant 0 : index
    %67 = vector.load %arg7[%c0_18, %c0_19, %c0_20] : memref<1x16x16xf32, #tpu.memory_space<vmem>>, vector<1x16x16xf32>
    %68 = vector.shape_cast %67 : vector<1x16x16xf32> to vector<16x16xf32>
    %69 = vector.shape_cast %66 : vector<16x16xf32> to vector<1x16x16xf32>
    tpu.vector_store %arg7[%c0_18, %c0_19, %c0_20], %69 {strides = array<i32>} : memref<1x16x16xf32, #tpu.memory_space<vmem>>, vector<1x16x16xf32>,
    %c1_i32 = arith.constant 1 : i32
    %70 = arith.addi %arg1, %c1_i32 : i32
    %c1_i32_21 = arith.constant 1 : i32
    %71 = arith.cmpi slt, %70, %c1_i32_21 : i32
    %72 = arith.extui %71 : i1 to i32
    %c0_i32_22 = arith.constant 0 : i32
    %73 = arith.cmpi ne, %72, %c0_i32_22 : i32
    scf.if %73 {
      %c0_23 = arith.constant 0 : index
      %c0_24 = arith.constant 0 : index
      %74 = vector.load %arg8[%c0_23, %c0_24] : memref<8x16xf32, #tpu.memory_space<vmem>>, vector<8x16xf32>
      tpu.vector_store %arg8[%c0_23, %c0_24], %5 {strides = array<i32>} : memref<8x16xf32, #tpu.memory_space<vmem>>, vector<8x16xf32>,
      %c0_25 = arith.constant 0 : index
      %c0_26 = arith.constant 0 : index
      %75 = vector.load %arg9[%c0_25, %c0_26] : memref<16x16xf32, #tpu.memory_space<vmem>>, vector<16x16xf32>
      tpu.vector_store %arg9[%c0_25, %c0_26], %35 {strides = array<i32>} : memref<16x16xf32, #tpu.memory_space<vmem>>, vector<16x16xf32>,
    } else {
    }
    return
  }
  func.func @transform_0(%arg0: i32, %arg1: i32) -> (i32, i32, i32) {
    %c0_i32 = arith.constant 0 : i32
    %c0_i32_0 = arith.constant 0 : i32
    return %arg0, %c0_i32, %arg1 : i32, i32, i32
  }
  func.func @transform_1(%arg0: i32, %arg1: i32) -> (i32, i32) {
    %c0_i32 = arith.constant 0 : i32
    %c0_i32_0 = arith.constant 0 : i32
    %c0_i32_1 = arith.constant 0 : i32
    return %c0_i32, %c0_i32_0 : i32, i32
  }
  func.func @transform_2(%arg0: i32, %arg1: i32) -> (i32, i32) {
    %c0_i32 = arith.constant 0 : i32
    %c0_i32_0 = arith.constant 0 : i32
    %c0_i32_1 = arith.constant 0 : i32
    return %c0_i32, %c0_i32_0 : i32, i32
  }
  func.func @transform_3(%arg0: i32, %arg1: i32) -> (i32, i32) {
    %c0_i32 = arith.constant 0 : i32
    %c0_i32_0 = arith.constant 0 : i32
    %c0_i32_1 = arith.constant 0 : i32
    return %c0_i32, %c0_i32_0 : i32, i32
  }
  func.func @transform_4(%arg0: i32, %arg1: i32) -> (i32, i32) {
    %c0_i32 = arith.constant 0 : i32
    %c0_i32_0 = arith.constant 0 : i32
    %c0_i32_1 = arith.constant 0 : i32
    return %c0_i32, %c0_i32_0 : i32, i32
  }
  func.func @transform_5(%arg0: i32, %arg1: i32) -> (i32, i32, i32) {
    %c0_i32 = arith.constant 0 : i32
    %c0_i32_0 = arith.constant 0 : i32
    return %arg0, %c0_i32, %arg1 : i32, i32, i32
  }
}

</mosaic_0001>

<bundles_post_ra>
// kernel: tpu_custom_call.1
= control target key start
LH: loop header
LB: loop body
LE: loop exit
PB: predicated region body
PF: predicated region fallthrough
CT: control target
= control target key end

     0   :  { %10 = vsyncpa [#allocation5], 0  ;;  %s1144_s0 = inlined_call_operand.vmem [shape: f32[2,8,16], index: 0, kind: input, shape index: {}]   ;;  %s1145_s1 = inlined_call_operand.vmem [shape: f32[32,24], index: 1, kind: input, shape index: {}]   ;;  %s1146_s2 = inlined_call_operand.vmem [shape: f32[32,1], index: 2, kind: input, shape index: {}]   ;;  %s1147_s3 = inlined_call_operand.vmem [shape: f32[16,48], index: 3, kind: input, shape index: {}]   ;;  %s1148_s4 = inlined_call_operand.vmem [shape: f32[16,1], index: 4, kind: input, shape index: {}]   ;;  %s1149_s5 = inlined_call_operand.hbm [shape: f32[2,16,16], index: 5, kind: output, shape index: {}]  }
   0x1   :  { %12 = vsyncpa [#allocation5 + $0x1], 0  ;;  %s931_s18 = smov 0   ;;  %s933_s19 = smov 0  }
   0x2   :  { %s935_s20 = smov 0   ;;  %s937_s21 = smov 0  }
   0x3   :  { %s939_s22 = smov 0   ;;  %s941_s23 = smov 0  }
   0x4 LB: > { %s688_s24 = sadd.s32 4294967295, %s890_s23   ;;  %s689_s25 = sadd.s32 4294967294, %s890_s23   ;;  %s890_s23 = sphi %s941_s23, %s18_s23   ;;  %s886_s22 = sphi %s939_s22, %s1156_s22   ;;  %s882_s21 = sphi %s937_s21, %s1155_s21   ;;  %s878_s20 = sphi %s935_s20, %s1154_s20   ;;  %s874_s19 = sphi %s933_s19, %s1153_s19   ;;  %s870_s18 = sphi %s931_s18, %s1152_s18  }
   0x5   : > { %s30_s26 = sadd.s32 1, %s886_s22  ;;  %s151_s27 = sadd.s32 1, %s878_s20 }
   0x6   : > { %p32_p0 = scmp.ge.s32.totalorder %s30_s26, 2  ;;  %p161_p1 = scmp.ne.s32.totalorder %s878_s20, %s874_s19 }
   0x7   : > { %p162_p2 = scmp.eq.s32.totalorder %s688_s24, 1  ;;  %p167_p3 = scmp.ne.s32.totalorder %s874_s19, %s870_s18 }
   0x8   : > { %s1158_s26 = smov (%p32_p0, %s30_s26), 0  ;;  %p168_p5 = scmp.eq.s32.totalorder %s689_s25, 1 }
   0x9   : > { %p971_p4 = por %p162_p2, %p161_p1  ;;  %s146_s29 = ssub.s32 %s886_s22, %s1158_s26 }
   0xa   : > { %p692_p6 = scmp.ge.s32.totalorder %s890_s23, 1  ;;  %p149_p7 = scmp.eq.s32.totalorder %s146_s29, 0 }
   0xb   : > { %p978_p8 = por %p168_p5, %p167_p3  ;;  %p208_p9 = scmp.lt.s32.totalorder %s890_s23, 3 }
   0xc   : > { %s984_s6 = scalar_select %p149_p7, %s878_s20, %s151_s27  }
   0xd   : > { %p209_p10 = pnand %p692_p6, %p208_p9 }
   0xe   : > { %p238_p11 = scmp.lt.s32.totalorder (!%p209_p10), %s882_s21, 1  ;;  %s893_s12 = smov (!%p209_p10), 4  }
   0xf   : > { %212 = sbr.rel (%p209_p10) target bundleno = 700 (0x2bc), region = 40  ;;  %s894_s13 = smov (!%p209_p10), 114  }
  0x10   : > { %s895_s16 = smov (!%p209_p10), 2   ;;  %s897_s17 = smov (!%p209_p10), 116  }
  0x11   : > { %s235_s10 = sand.u32 (!%p209_p10), 1, %s874_s19   ;;  %s706_s24 = sshll.u32 (!%p209_p10), %s882_s21, 8 }
  0x12   : > { %s1093_s29 = scalar_lea.hbm (!%p209_p10), %s1149_s5, %s706_s24 }
  0x14   : > { %vm249_vm0 = vcmask 130048   ;;  %v892_v0 = vmov 0.0   ;;  %s239_s7 = scalar_select %p238_p11, %s882_s21, 1  ;;  %v257_v3 = vld [vmem:[%s1145_s1] sm:$0xff]  ;;  %vm325_vm1 = vcmask 195584   ;;  %v896_v4 = vmov 0  }
  0x15   : > { %250 = vst.msk [vmem:[#allocation2] sm:$0xff] %vm249_vm0, %v892_v0  ;;  %251 = vst.msk [vmem:[#allocation3] sm:$0xff] %vm249_vm0, %v892_v0  ;;  %728 = vmatprep.mubr.msk.f32.mxu0 %vm325_vm1, %v257_v3  ;;  %812 = vset.pattern.permute.xlu0 %v896_v4  ;;  %v302_v5 = vld [vmem:[%s1146_s2 + $0x8] sm:$0xff]  ;;  %v301_v6 = vld [vmem:[%s1146_s2] sm:$0xff]  ;;  %v253_v9 = vlaneseq  ;;  %vm289_vm2 = vcmask 15360   ;;  %vm269_vm4 = vcmask 31744  }
  0x16   : > { %252 = vst.msk [vmem:[#allocation3 + $0x8] sm:$0xff] %vm249_vm0, %v892_v0  ;;  %s694_s8 = sshll.u32 %s239_s7, 3  ;;  %813 = vset.pattern.permute.xlu1 %v896_v4  ;;  %v258_v25 = vld [vmem:[%s1145_s1 + $0x8] sm:$0xff]  ;;  %v259_v26 = vld [vmem:[%s1145_s1 + $0x10] sm:$0xff]  ;;  %v260_v27 = vld [vmem:[%s1145_s1 + $0x18] sm:$0xff]  ;;  %vm503_vm6 = vcmask 392192  }
  0x17   : > { %s244_s11 = scalar_lea.vmem %s1144_s0, %s694_s8  ;;  %v1018_v12 = vand.u32 127, %v253_v9  ;;  %v423_v34 = vld [vmem:[%s1147_s3] sm:$0xff]  ;;  %v304_v35 = vld [vmem:[%s1146_s2 + $0x18] sm:$0xff]  ;;  %v303_v36 = vld [vmem:[%s1146_s2 + $0x10] sm:$0xff]  ;;  %s1099_s21 = scalar_lea.sflag [#allocation5], %s235_s10 }
  0x18   : > { %v255_v1 = vld [vmem:[%s244_s11] sm:$0xff]  ;;  %746 = vmatprep.mubr.msk.f32.mxu1 %vm503_vm6, %v423_v34  ;;  %v492_v37 = vld [vmem:[%s1148_s4 + $0x8] sm:$0xff]  ;;  %s693_s11 = sshll.u32 %s235_s10, 4 }
  0x19   : > { %266 = vrot.lane.b32.xlu1 %v255_v1, %s893_s12  ;;  %283 = vrot.lane.b32.xlu0 %v255_v1, %s894_s13  ;;  %vm282_vm3 = vcmp.ge.s32.totalorder %v1018_v12, 2  ;;  %vm261_vm5 = vcmp.ge.s32.totalorder %v1018_v12, 4  ;;  %v491_v38 = vld [vmem:[%s1148_s4] sm:$0xff]  ;;  %v424_v3 = vld [vmem:[%s1147_s3 + $0x8] sm:$0xff]  ;;  %s237_s14 = scalar_lea.vmem [#allocation4], %s693_s11 }
  0x1a   : > { %722 = vmatprep.subr.mxu0 %v255_v1  ;;  %s613_s15 = sshll.u32 %s237_s14, 4  ;;  %s1095_s15 = int_to_ptr.vmem [resolvable:$true] %s613_s15 }
  0x1b   : > { %723 = vmatpush3.msra.mxu0 %v255_v1  ;;  %s814_s7 = scalar_lea.vmem %s1095_s15, 256 }
  0x1c   : > { %v256_v2 = vld [vmem:[#allocation2] sm:$0xff]  ;;  %v425_v8 = vld [vmem:[#allocation3] sm:$0xff]  ;;  %p815_p12 = scmp.ne.s32.totalorder %s1095_s15, %s814_s7 }
  0x1d   : > { %291 = vrot.lane.b32.xlu1 %v256_v2, %s894_s13  ;;  %286 = vrot.lane.b32.xlu0 %v255_v1, %s895_s16  ;;  %v426_v7 = vld [vmem:[#allocation3 + $0x8] sm:$0xff] }
  0x1e   : > { %p816_p13 = pnand %p815_p12, %p971_p4 }
  0x20   : > { %p817_p0 = pneg %p816_p13 }
  0x21   : > { %294 = vrot.lane.b32.xlu1 %v256_v2, %s895_s16  ;;  %263 = vrot.lane.b32.xlu0 %v255_v1, %s897_s17 }
  0x25   : > { %275 = vrot.lane.b32.xlu1 %v256_v2, %s893_s12  ;;  %272 = vrot.lane.b32.xlu0 %v256_v2, %s897_s17 }
  0x29   : > { %312 = vperm.xlu0 %812, %v302_v5   ;;  %307 = vperm.xlu1 %813, %v301_v6  }
  0x2d   : > { %477 = vrot.lane.b32.xlu1 %v426_v7, %s894_s13  ;;  %483 = vrot.lane.b32.xlu0 %v426_v7, %s895_s16 }
  0x31   : > { %475 = vrot.lane.b32.xlu1 %v425_v8, %s894_s13  ;;  %481 = vrot.lane.b32.xlu0 %v425_v8, %s895_s16 }
  0x35   : > { %447 = vrot.lane.b32.xlu1 %v426_v7, %s897_s17  ;;  %453 = vrot.lane.b32.xlu0 %v426_v7, %s893_s12 }
  0x8b   : > { %v267_v10 = vpop.permute.xlu1 %266  ;;  %v284_v11 = vpop.permute.xlu0 %283 }
  0x8f   : > { %v292_v13 = vpop.permute.xlu1 %291  ;;  %v287_v14 = vpop.permute.xlu0 %286 }
  0x90   : > { %v290_v17 = vsel %vm289_vm2, %v284_v11, %v287_v14 }
  0x93   : > { %v295_v15 = vpop.permute.xlu1 %294  ;;  %v264_v16 = vpop.permute.xlu0 %263 }
  0x94   : > { %v297_v18 = vsel %vm289_vm2, %v292_v13, %v295_v15  ;;  %v270_v22 = vsel %vm269_vm4, %v264_v16, %v267_v10 }
  0x95   : > { %v300_v19 = vsel %vm282_vm3, %v290_v17, %v297_v18 }
  0x96   : > { %724 = vmatprep.subr.mxu0 %v300_v19 }
  0x97   : > { %v276_v20 = vpop.permute.xlu1 %275  ;;  %v273_v21 = vpop.permute.xlu0 %272  ;;  %725 = vmatpush3.msra.mxu0 %v300_v19 }
  0x98   : > { %v278_v23 = vsel %vm269_vm4, %v273_v21, %v276_v20 }
  0x99   : > { %v281_v24 = vsel %vm261_vm5, %v270_v22, %v278_v23 }
  0x9a   : > { %726 = vmatprep.subr.mxu0 %v281_v24 }
  0x9b   : > { %727 = vmatpush3.msra.mxu0 %v281_v24 }
  0x9c   : > { %729 = vmatmul.mubr.msk.f32.vlgmr.msra.gmra.mxu0 %vm325_vm1, %v258_v25 }
  0x9d   : > { %731 = vmatprep.mubr.msk.f32.mxu0 %vm325_vm1, %v259_v26 }
  0xa0   : > { %732 = vmatmul.mubr.msk.f32.gmra.mxu0 %vm325_vm1, %v260_v27 }
  0xa4   : > { %v313_v28 = vpop.permute.xlu0 %312  ;;  %v308_v30 = vpop.permute.xlu1 %307 }
  0xa8   : > { %v478_v39 = vpop.permute.xlu1 %477  ;;  %v484_v40 = vpop.permute.xlu0 %483 }
  0xa9   : > { %v488_v47 = vsel %vm289_vm2, %v478_v39, %v484_v40 }
  0xac   : > { %v476_v41 = vpop.permute.xlu1 %475  ;;  %v482_v42 = vpop.permute.xlu0 %481 }
  0xad   : > { %v487_v54 = vsel %vm289_vm2, %v476_v41, %v482_v42 }
  0xb0   : > { %v448_v43 = vpop.permute.xlu1 %447  ;;  %v454_v44 = vpop.permute.xlu0 %453 }
  0xb1   : > { %v458_v58 = vsel %vm269_vm4, %v448_v43, %v454_v44 }
 0x15c   : > { %v730_v29 = vpop.f32.mrf.mxu0 }
 0x15d   : > { %v410_v31 = vadd.f32 %v730_v29, %v313_v28 }
 0x15e   : > { %v404_v32 = vpop.f32.mrf.mxu0 }
 0x15f   : > { %v405_v33 = vadd.f32 %v404_v32, %v308_v30  ;;  %469 = vrot.lane.b32.xlu0 %v410_v31, %s895_s16  ;;  %463 = vrot.lane.b32.xlu1 %v410_v31, %s894_s13 }
 0x160   : > { %734 = vmatprep.subr.mxu1 %v410_v31  ;;  %v733_v5 = vpop.f32.mrf.mxu0 }
 0x161   : > { %735 = vmatpush3.msra.mxu1 %v410_v31 }
 0x162   : > { %736 = vmatprep.subr.mxu1 %v405_v33  ;;  %v414_v7 = vpop.f32.mrf.mxu0 }
 0x163   : > { %737 = vmatpush3.msra.mxu1 %v405_v33  ;;  %437 = vrot.lane.b32.xlu0 %v410_v31, %s893_s12 }
 0x164   : > { %431 = vrot.lane.b32.xlu1 %v410_v31, %s897_s17 }
 0x167   : > { %467 = vrot.lane.b32.xlu0 %v405_v33, %s895_s16  ;;  %s898_s16 = smov [#allocation4]  }
 0x168   : > { %461 = vrot.lane.b32.xlu1 %v405_v33, %s894_s13  ;;  %s818_s13 = sshll.u32 %s898_s16, 4  ;;  %s819_s13 = int_to_ptr.vmem [resolvable:$false] %s818_s13 }
 0x169   : > { %s820_s8 = scalar_lea.vmem %s819_s13, 512  ;;  %p821_p1 = scmp.lt.s32.totalorder %s1095_s15, %s819_s13 }
 0x16a   : > { %p822_p2 = scmp.lt.s32.totalorder %s820_s8, %s814_s7 }
 0x16b   : > { %435 = vrot.lane.b32.xlu0 %v405_v33, %s893_s12 }
 0x16c   : > { %429 = vrot.lane.b32.xlu1 %v405_v33, %s897_s17  ;;  %p823_p3 = por %p822_p2, %p821_p1 }
 0x16e   : > { %p824_p5 = pnand %p823_p3, %p817_p0 }
 0x16f   : > { %451 = vrot.lane.b32.xlu0 %v425_v8, %s893_s12 }
 0x170   : > { %445 = vrot.lane.b32.xlu1 %v425_v8, %s897_s17 }
 0x173   : > { %322 = vperm.xlu0 %812, %v304_v35  }
 0x174   : > { %317 = vperm.xlu1 %813, %v303_v36  }
 0x177   : > { %500 = vperm.xlu0 %812, %v492_v37  }
 0x178   : > { %495 = vperm.xlu1 %813, %v491_v38  }
 0x1d1   : > { %v470_v45 = vpop.permute.xlu0 %469  ;;  %v464_v46 = vpop.permute.xlu1 %463 }
 0x1d2   : > { %v474_v48 = vsel %vm289_vm2, %v464_v46, %v470_v45 }
 0x1d3   : > { %v490_v49 = vsel %vm282_vm3, %v474_v48, %v488_v47 }
 0x1d4   : > { %738 = vmatprep.subr.mxu1 %v490_v49 }
 0x1d5   : > { %v438_v50 = vpop.permute.xlu0 %437  ;;  %739 = vmatpush3.msra.mxu1 %v490_v49 }
 0x1d6   : > { %v432_v51 = vpop.permute.xlu1 %431 }
 0x1d7   : > { %v442_v55 = vsel %vm269_vm4, %v432_v51, %v438_v50 }
 0x1d8   : > { %v460_v61 = vsel %vm261_vm5, %v442_v55, %v458_v58 }
 0x1d9   : > { %v468_v52 = vpop.permute.xlu0 %467 }
 0x1da   : > { %v462_v53 = vpop.permute.xlu1 %461 }
 0x1db   : > { %v473_v56 = vsel %vm289_vm2, %v462_v53, %v468_v52 }
 0x1dc   : > { %v489_v57 = vsel %vm282_vm3, %v473_v56, %v487_v54 }
 0x1dd   : > { %740 = vmatprep.subr.mxu1 %v489_v57  ;;  %v436_v59 = vpop.permute.xlu0 %435 }
 0x1de   : > { %v430_v60 = vpop.permute.xlu1 %429  ;;  %741 = vmatpush3.msra.mxu1 %v489_v57 }
 0x1df   : > { %742 = vmatprep.subr.mxu1 %v460_v61  ;;  %v441_v0 = vsel %vm269_vm4, %v430_v60, %v436_v59 }
 0x1e0   : > { %743 = vmatpush3.msra.mxu1 %v460_v61 }
 0x1e1   : > { %v452_v62 = vpop.permute.xlu0 %451 }
 0x1e2   : > { %v446_v63 = vpop.permute.xlu1 %445 }
 0x1e3   : > { %v457_v1 = vsel %vm269_vm4, %v446_v63, %v452_v62 }
 0x1e4   : > { %v459_v2 = vsel %vm261_vm5, %v441_v0, %v457_v1 }
 0x1e5   : > { %744 = vmatprep.subr.mxu1 %v459_v2 }
 0x1e6   : > { %745 = vmatpush3.msra.mxu1 %v459_v2 }
 0x1e7   : > { %747 = vmatmul.mubr.msk.f32.vlgmr.msra.gmra.mxu1 %vm503_vm6, %v424_v3 }
 0x1ee   : > { %v323_v4 = vpop.permute.xlu0 %322 }
 0x1ef   : > { %v318_v6 = vpop.permute.xlu1 %317  ;;  %v420_v10 = vadd.f32 %v733_v5, %v323_v4 }
 0x1f0   : > { %v415_v14 = vadd.f32 %v414_v7, %v318_v6 }
 0x1f2   : > { %v501_v8 = vpop.permute.xlu0 %500 }
 0x1f3   : > { %v496_v12 = vpop.permute.xlu1 %495 }
 0x2a7   : > { %v748_v9 = vpop.f32.mrf.mxu1 }
 0x2a8   : > { %v582_v11 = vadd.f32 %v748_v9, %v501_v8 }
 0x2a9   : > { %v576_v13 = vpop.f32.mrf.mxu1 }
 0x2aa   : > { %v586_v15 = vadd.f32 %v582_v11, %v420_v10  ;;  %v577_v16 = vadd.f32 %v576_v13, %v496_v12 }
 0x2ac   : > { %589 = vst.msk [vmem:[%s237_s14 + $0x8] sm:$0xff] %vm249_vm0, %v586_v15  ;;  %v585_v17 = vadd.f32 %v577_v16, %v415_v14 }
 0x2ae   : > { %588 = vst.msk [vmem:[%s237_s14] sm:$0xff] %vm249_vm0, %v585_v17 }
 0x2af   : > { %827 = shalt.err (!%p824_p5)
}
 0x2b0   : > { %s828_s9 = scalar_lea.hbm %s1093_s29, 256  ;;  %s832_s10 = scalar_lea.hbm %s1149_s5, 512 }
 0x2b1   : > { %p829_p6 = scmp.ne.s32.totalorder %s1093_s29, %s828_s9  ;;  %p833_p10 = scmp.lt.s32.totalorder %s1093_s29, %s1149_s5 }
 0x2b2   : > { %p834_p11 = scmp.lt.s32.totalorder %s832_s10, %s828_s9 }
 0x2b3   : > { %p830_p7 = pnand %p829_p6, %p971_p4 }
 0x2b4   : > { %p835_p12 = por %p834_p11, %p833_p10 }
 0x2b5   : > { %p831_p9 = pneg %p830_p7 }
 0x2b7   : > { %p836_p13 = pnand %p835_p12, %p831_p9 }
 0x2b9   : > { %839 = shalt.err (!%p836_p13)
}
 0x2ba   : > { %s899_s24 = smov 128   ;;  %s900_s25 = smov 8  }
 0x2bb   : > { %749 = dma.vmem_to_hbm [thread:$0]  (%p971_p4), %s1095_s15, 256, %s1093_s29, %s1099_s21, %s899_s24, %s899_s24, %s900_s25  }
 0x2bc PF: > { %p755_p0 = scmp.ge.s32.totalorder %s890_s23, 2  ;;  %s628_s27 = sand.u32 1, %s870_s18  }
 0x2bd   : > { %s629_s7 = scalar_lea.sflag [#allocation5], %s628_s27 }
 0x2be   : > { %p752_p1 = pnand %p755_p0, %p978_p8 }
 0x2c0   : > { %p753_p2 = pneg %p752_p1 }
 0x2c2   : > { %865 = dma.done.wait (%p753_p2), %s629_s7, 256  }
 0x2c3   : > { %867 = vsyncadd (%p753_p2), %s629_s7, 4294967040  ;;  %s18_s23 = sadd.s32 1, %s890_s23   ;;  %s1152_s18 = smov %s874_s19 }
 0x2c4   : > { %p15_p3 = scmp.ge.s32.totalorder %s18_s23, 4   ;;  %s1153_s19 = smov %s878_s20 }
 0x2c5   : > { %s1154_s20 = smov %s984_s6  ;;  %s1155_s21 = smov %s886_s22 }
 0x2c6   : > { %s1156_s22 = smov %s1158_s26  ;;  %17 = sbr.rel (!%p15_p3) target bundleno = 4 (0x4), region = 83 }
 0x2cb   :  { %634 = vsyncpa [#allocation5], 1 }
 0x2cc   :  { %636 = vsyncpa [#allocation5 + $0x1], 1 }

</bundles_post_ra>
